<compile_context>
chip_gen: v7x
topology: tpu7x:2x2x1
jax: 0.10.0
libtpu: 0.0.40
codegen_flags: <defaults>
</compile_context>

<pallas_src>
import functools

import jax
import jax.numpy as jnp
from jax.experimental import pallas as pl
from jax.experimental.pallas import tpu as pltpu

PAD = 128        # lane-dense feature width (vreg lane count)
ROW_ALIGN = 16   # bf16 sublane packing: one vreg holds [16, 128] bf16


def _round_up(n, m):
    return ((n + m - 1) // m) * m


def _calculate_block_dims(latent_dim, input_dim, num_blocks):
    step = (input_dim - latent_dim) / num_blocks
    return [int(latent_dim + i * step) for i in range(num_blocks + 1)]


def _weight_layout(dims, num_blocks):
    """Per-layer (row_offset, padded_in_rows) inside the compact bf16 weight slab."""
    in_dims = [dims[l] for l in range(num_blocks + 1)]   # layer l consumes dims[l]
    rows = tuple(_round_up(d, ROW_ALIGN) for d in in_dims)
    offs, acc = [], 0
    for r in rows:
        offs.append(acc)
        acc += r
    return tuple(offs), rows, acc


# ---------------------------------------------------------------------------
# Pallas kernel: full Generator forward (single grid point, whole-VMEM).
# ---------------------------------------------------------------------------
def _generator_kernel(num_blocks, w_offs, w_rows, z_ref, w_ref, v_ref, out_ref):
    """z_ref: (B, PAD) f32; w_ref: (total_rows, PAD) bf16; v_ref: (v_rows, PAD) f32.

    v_ref row layout:
        row 0                    -> bias of block 0
        rows 1+2*(i-1), 2+2*(i-1)-> gamma, beta of BN block i (i = 1..num_blocks-1)
        row 1+2*(num_blocks-1)   -> bias of final Linear
    (BN-block biases are dropped: cancelled exactly by batch-mean subtraction.)
    """

    def linear(x, l):
        off, rows = w_offs[l], w_rows[l]
        xk = x[:, :rows].astype(jnp.bfloat16)          # padded cols are zeros
        w = w_ref[pl.ds(off, rows), :]
        return jnp.dot(xk, w, preferred_element_type=jnp.float32)

    def leaky_relu(x):
        return jnp.maximum(x, 0.2 * x)                  # slope 0.2 < 1 => exact

    x = z_ref[...]

    # Block 0: Linear + bias + LeakyReLU (no normalization).
    x = leaky_relu(linear(x, 0) + v_ref[pl.ds(0, 1), :])

    # Blocks 1..num_blocks-1: Linear + BatchNorm1d(eps=0.8, batch stats) + LeakyReLU.
    for i in range(1, num_blocks):
        y = linear(x, i)                                 # bias dropped (dead under BN)
        gamma = v_ref[pl.ds(1 + 2 * (i - 1), 1), :]
        beta = v_ref[pl.ds(2 + 2 * (i - 1), 1), :]
        m = jnp.mean(y, axis=0, keepdims=True)
        yc = y - m
        var = jnp.mean(yc * yc, axis=0, keepdims=True)   # biased, two-pass (centered)
        s = gamma * jax.lax.rsqrt(var + 0.8)             # folded BN affine
        x = leaky_relu(yc * s + beta)

    # Final Linear + bias + Tanh.
    b_last = v_ref[pl.ds(1 + 2 * (num_blocks - 1), 1), :]
    out_ref[...] = jnp.tanh(linear(x, num_blocks) + b_last)


# ---------------------------------------------------------------------------
# Wrapper
# ---------------------------------------------------------------------------
def generator_forward(z, w_slab, v_slab, dims, num_blocks, input_dim):
    batch, latent = z.shape
    offs, rows, _total = _weight_layout(dims, num_blocks)
    z_pad = jnp.pad(z.astype(jnp.float32), ((0, 0), (0, PAD - latent)))

    matmul_flops = sum(2 * batch * r * PAD for r in rows)
    flops = matmul_flops + 16 * batch * PAD * (num_blocks - 1)
    transcendentals = batch * PAD + (num_blocks - 1) * PAD          # tanh + rsqrt
    bytes_accessed = (z_pad.size * 4 + w_slab.size * 2
                      + v_slab.size * 4 + batch * PAD * 4)

    out = pl.pallas_call(
        functools.partial(_generator_kernel, num_blocks, offs, rows),
        out_shape=jax.ShapeDtypeStruct((batch, PAD), jnp.float32),
        in_specs=[pl.BlockSpec(memory_space=pltpu.MemorySpace.VMEM)] * 3,
        out_specs=pl.BlockSpec(memory_space=pltpu.MemorySpace.VMEM),
        cost_estimate=pl.CostEstimate(
            flops=flops,
            transcendentals=transcendentals,
            bytes_accessed=bytes_accessed,
        ),
        compiler_params=pltpu.CompilerParams(vmem_limit_bytes=4 * 1024 * 1024),
    )(z_pad, w_slab, v_slab)
    return out[:, :input_dim]


# ---------------------------------------------------------------------------
# Parameter construction (shapes follow Generator.__init__) + slab packing
# ---------------------------------------------------------------------------
def init_generator_params(key, input_dim, latent_dim, num_blocks):
    dims = _calculate_block_dims(latent_dim, input_dim, num_blocks)
    params = []

    def linear_init(key, in_f, out_f):
        kw, kb = jax.random.split(key)
        bound = 1.0 / jnp.sqrt(float(in_f))
        w = jax.random.uniform(kw, (in_f, out_f), jnp.float32, -bound, bound)
        b = jax.random.uniform(kb, (1, out_f), jnp.float32, -bound, bound)
        return w, b

    keys = jax.random.split(key, num_blocks + 1)

    # Block 0 (no BN).
    w, b = linear_init(keys[0], dims[0], dims[1])
    params += [w, b]

    # Blocks 1..num_blocks-1 (with BN; gamma=1, beta=0 = PyTorch defaults).
    for i in range(1, num_blocks):
        w, b = linear_init(keys[i], dims[i], dims[i + 1])
        gamma = jnp.ones((1, dims[i + 1]), jnp.float32)
        beta = jnp.zeros((1, dims[i + 1]), jnp.float32)
        params += [w, b, gamma, beta]

    # Final Linear(dims[-1] -> input_dim).
    w, b = linear_init(keys[num_blocks], dims[-1], input_dim)
    params += [w, b]
    return params, dims


def pack_generator_params(params, dims, num_blocks):
    """Pack params into a compact bf16 weight slab + a small f32 vector slab."""
    offs, _rows, total_rows = _weight_layout(dims, num_blocks)
    nbn = num_blocks - 1
    v_rows = _round_up(2 + 2 * nbn, 8)

    w_slab = jnp.zeros((total_rows, PAD), jnp.bfloat16)
    v_slab = jnp.zeros((v_rows, PAD), jnp.float32)

    idx = 0
    # Block 0.
    w, b = params[idx], params[idx + 1]
    idx += 2
    w_slab = w_slab.at[offs[0]:offs[0] + w.shape[0], :w.shape[1]].set(
        w.astype(jnp.bfloat16))
    v_slab = v_slab.at[0, :b.shape[1]].set(b[0])
    # BN blocks 1..num_blocks-1 (Linear biases dropped; gamma/beta adjacent rows).
    for i in range(1, num_blocks):
        w, _b, g, be = params[idx], params[idx + 1], params[idx + 2], params[idx + 3]
        idx += 4
        w_slab = w_slab.at[offs[i]:offs[i] + w.shape[0], :w.shape[1]].set(
            w.astype(jnp.bfloat16))
        v_slab = v_slab.at[1 + 2 * (i - 1), :g.shape[1]].set(g[0])
        v_slab = v_slab.at[2 + 2 * (i - 1), :be.shape[1]].set(be[0])
    # Final layer.
    w, b = params[idx], params[idx + 1]
    w_slab = w_slab.at[offs[num_blocks]:offs[num_blocks] + w.shape[0],
                       :w.shape[1]].set(w.astype(jnp.bfloat16))
    v_slab = v_slab.at[1 + 2 * nbn, :b.shape[1]].set(b[0])
    return w_slab, v_slab


# ---------------------------------------------------------------------------
# Pure-JAX reference (mirrors the PyTorch forward, f32 weights) for verification
# ---------------------------------------------------------------------------
def generator_reference(z, params, num_blocks):
    def leaky_relu(x):
        return jnp.where(x > 0, x, 0.2 * x)

    x = z.astype(jnp.float32)
    idx = 0
    x = leaky_relu(x @ params[idx] + params[idx + 1]); idx += 2
    for _ in range(1, num_blocks):
        x = x @ params[idx] + params[idx + 1]
        gamma, beta = params[idx + 2], params[idx + 3]
        idx += 4
        mean = jnp.mean(x, axis=0, keepdims=True)
        var = jnp.mean((x - mean) ** 2, axis=0, keepdims=True)  # biased variance
        x = (x - mean) * jax.lax.rsqrt(var + 0.8) * gamma + beta
        x = leaky_relu(x)
    x = x @ params[idx] + params[idx + 1]
    return jnp.tanh(x)


if __name__ == "__main__":
    input_dim = 64     # flattened "image" size
    latent_dim = 16
    num_blocks = 5
    batch = 8

    key = jax.random.PRNGKey(0)
    kz, kp = jax.random.split(key)

    params, dims = init_generator_params(kp, input_dim, latent_dim, num_blocks)
    z = jax.random.normal(kz, (batch, latent_dim), jnp.float32)

    w_slab, v_slab = pack_generator_params(params, dims, num_blocks)

    out = generator_forward(z, w_slab, v_slab, dims, num_blocks, input_dim)
    out = jax.block_until_ready(out)

    ref = generator_reference(z, params, num_blocks)
    assert out.shape == (batch, input_dim)
    # bf16 weight slab => ~1e-2 scale tolerance vs the f32 reference.
    assert jnp.allclose(out, ref, atol=2e-2, rtol=2e-2), "mismatch vs reference"

    print("KERNEL_OK")
</pallas_src>

<mosaic_0001>
module attributes {stable_mosaic.version = 11 : i64} {
  func.func @_generator_kernel(%arg0: memref<8x128xf32, #tpu.memory_space<vmem>>, %arg1: memref<272x128xbf16, #tpu.memory_space<vmem>>, %arg2: memref<16x128xf32, #tpu.memory_space<vmem>>, %arg3: memref<8x128xf32, #tpu.memory_space<vmem>>) attributes {dimension_semantics = [], scalar_prefetch = 0 : i64, scratch_operands = 0 : i64, tpu.core_type = #tpu.core_type<tc>} {
    %c0 = arith.constant 0 : index
    %c0_0 = arith.constant 0 : index
    %0 = vector.load %arg0[%c0, %c0_0] : memref<8x128xf32, #tpu.memory_space<vmem>>, vector<8x128xf32>
    %1 = vector.extract_strided_slice %0 {offsets = [0, 0], sizes = [8, 16], strides = [1, 1]} : vector<8x128xf32> to vector<8x16xf32>
    %2 = arith.truncf %1 : vector<8x16xf32> to vector<8x16xbf16>
    %c0_1 = arith.constant 0 : index
    %c0_2 = arith.constant 0 : index
    %3 = vector.load %arg1[%c0_1, %c0_2] : memref<272x128xbf16, #tpu.memory_space<vmem>>, vector<16x128xbf16>
    %cst = arith.constant dense<0.000000e+00> : vector<8x128xf32>
    %4 = tpu.matmul %2, %3, %cst {dimension_numbers = #tpu.dot_dimension_numbers<[1], [0], [0], [1], [0, 0, 1, 1], [], []>} : vector<8x16xbf16>, vector<16x128xbf16>, vector<8x128xf32> -> vector<8x128xf32>
    %c0_3 = arith.constant 0 : index
    %c0_4 = arith.constant 0 : index
    %5 = vector.load %arg2[%c0_3, %c0_4] : memref<16x128xf32, #tpu.memory_space<vmem>>, vector<1x128xf32>
    %6 = vector.broadcast %5 : vector<1x128xf32> to vector<8x128xf32>
    %7 = arith.addf %4, %6 : vector<8x128xf32>
    %cst_5 = arith.constant 2.000000e-01 : f32
    %8 = vector.broadcast %cst_5 : f32 to vector<8x128xf32>
    %9 = arith.mulf %8, %7 : vector<8x128xf32>
    %10 = arith.maximumf %7, %9 : vector<8x128xf32>
    %11 = vector.extract_strided_slice %10 {offsets = [0, 0], sizes = [8, 32], strides = [1, 1]} : vector<8x128xf32> to vector<8x32xf32>
    %12 = arith.truncf %11 : vector<8x32xf32> to vector<8x32xbf16>
    %c16 = arith.constant 16 : index
    %c0_6 = arith.constant 0 : index
    %13 = vector.load %arg1[%c16, %c0_6] : memref<272x128xbf16, #tpu.memory_space<vmem>>, vector<32x128xbf16>
    %cst_7 = arith.constant dense<0.000000e+00> : vector<8x128xf32>
    %14 = tpu.matmul %12, %13, %cst_7 {dimension_numbers = #tpu.dot_dimension_numbers<[1], [0], [0], [1], [0, 0, 1, 1], [], []>} : vector<8x32xbf16>, vector<32x128xbf16>, vector<8x128xf32> -> vector<8x128xf32>
    %c1 = arith.constant 1 : index
    %c0_8 = arith.constant 0 : index
    %15 = vector.load %arg2[%c1, %c0_8] : memref<16x128xf32, #tpu.memory_space<vmem>>, vector<1x128xf32>
    %c2 = arith.constant 2 : index
    %c0_9 = arith.constant 0 : index
    %16 = vector.load %arg2[%c2, %c0_9] : memref<16x128xf32, #tpu.memory_space<vmem>>, vector<1x128xf32>
    %cst_10 = arith.constant dense<0.000000e+00> : vector<128xf32>
    %17 = vector.multi_reduction <add>, %14, %cst_10 [0] : vector<8x128xf32> to vector<128xf32>
    %18 = vector.shape_cast %17 : vector<128xf32> to vector<1x128xf32>
    %cst_11 = arith.constant 8.000000e+00 : f32
    %19 = vector.broadcast %cst_11 : f32 to vector<1x128xf32>
    %20 = arith.divf %18, %19 : vector<1x128xf32>
    %21 = vector.broadcast %20 : vector<1x128xf32> to vector<8x128xf32>
    %22 = arith.subf %14, %21 : vector<8x128xf32>
    %23 = arith.mulf %22, %22 : vector<8x128xf32>
    %cst_12 = arith.constant dense<0.000000e+00> : vector<128xf32>
    %24 = vector.multi_reduction <add>, %23, %cst_12 [0] : vector<8x128xf32> to vector<128xf32>
    %25 = vector.shape_cast %24 : vector<128xf32> to vector<1x128xf32>
    %cst_13 = arith.constant 8.000000e+00 : f32
    %26 = vector.broadcast %cst_13 : f32 to vector<1x128xf32>
    %27 = arith.divf %25, %26 : vector<1x128xf32>
    %cst_14 = arith.constant 8.000000e-01 : f32
    %28 = vector.broadcast %cst_14 : f32 to vector<1x128xf32>
    %29 = arith.addf %27, %28 : vector<1x128xf32>
    %30 = math.rsqrt %29 : vector<1x128xf32>
    %31 = arith.mulf %15, %30 : vector<1x128xf32>
    %32 = vector.broadcast %31 : vector<1x128xf32> to vector<8x128xf32>
    %33 = arith.mulf %22, %32 : vector<8x128xf32>
    %34 = vector.broadcast %16 : vector<1x128xf32> to vector<8x128xf32>
    %35 = arith.addf %33, %34 : vector<8x128xf32>
    %cst_15 = arith.constant 2.000000e-01 : f32
    %36 = vector.broadcast %cst_15 : f32 to vector<8x128xf32>
    %37 = arith.mulf %36, %35 : vector<8x128xf32>
    %38 = arith.maximumf %35, %37 : vector<8x128xf32>
    %39 = vector.extract_strided_slice %38 {offsets = [0, 0], sizes = [8, 48], strides = [1, 1]} : vector<8x128xf32> to vector<8x48xf32>
    %40 = arith.truncf %39 : vector<8x48xf32> to vector<8x48xbf16>
    %c48 = arith.constant 48 : index
    %c0_16 = arith.constant 0 : index
    %41 = vector.load %arg1[%c48, %c0_16] : memref<272x128xbf16, #tpu.memory_space<vmem>>, vector<48x128xbf16>
    %cst_17 = arith.constant dense<0.000000e+00> : vector<8x128xf32>
    %42 = tpu.matmul %40, %41, %cst_17 {dimension_numbers = #tpu.dot_dimension_numbers<[1], [0], [0], [1], [0, 0, 1, 1], [], []>} : vector<8x48xbf16>, vector<48x128xbf16>, vector<8x128xf32> -> vector<8x128xf32>
    %c3 = arith.constant 3 : index
    %c0_18 = arith.constant 0 : index
    %43 = vector.load %arg2[%c3, %c0_18] : memref<16x128xf32, #tpu.memory_space<vmem>>, vector<1x128xf32>
    %c4 = arith.constant 4 : index
    %c0_19 = arith.constant 0 : index
    %44 = vector.load %arg2[%c4, %c0_19] : memref<16x128xf32, #tpu.memory_space<vmem>>, vector<1x128xf32>
    %cst_20 = arith.constant dense<0.000000e+00> : vector<128xf32>
    %45 = vector.multi_reduction <add>, %42, %cst_20 [0] : vector<8x128xf32> to vector<128xf32>
    %46 = vector.shape_cast %45 : vector<128xf32> to vector<1x128xf32>
    %cst_21 = arith.constant 8.000000e+00 : f32
    %47 = vector.broadcast %cst_21 : f32 to vector<1x128xf32>
    %48 = arith.divf %46, %47 : vector<1x128xf32>
    %49 = vector.broadcast %48 : vector<1x128xf32> to vector<8x128xf32>
    %50 = arith.subf %42, %49 : vector<8x128xf32>
    %51 = arith.mulf %50, %50 : vector<8x128xf32>
    %cst_22 = arith.constant dense<0.000000e+00> : vector<128xf32>
    %52 = vector.multi_reduction <add>, %51, %cst_22 [0] : vector<8x128xf32> to vector<128xf32>
    %53 = vector.shape_cast %52 : vector<128xf32> to vector<1x128xf32>
    %cst_23 = arith.constant 8.000000e+00 : f32
    %54 = vector.broadcast %cst_23 : f32 to vector<1x128xf32>
    %55 = arith.divf %53, %54 : vector<1x128xf32>
    %cst_24 = arith.constant 8.000000e-01 : f32
    %56 = vector.broadcast %cst_24 : f32 to vector<1x128xf32>
    %57 = arith.addf %55, %56 : vector<1x128xf32>
    %58 = math.rsqrt %57 : vector<1x128xf32>
    %59 = arith.mulf %43, %58 : vector<1x128xf32>
    %60 = vector.broadcast %59 : vector<1x128xf32> to vector<8x128xf32>
    %61 = arith.mulf %50, %60 : vector<8x128xf32>
    %62 = vector.broadcast %44 : vector<1x128xf32> to vector<8x128xf32>
    %63 = arith.addf %61, %62 : vector<8x128xf32>
    %cst_25 = arith.constant 2.000000e-01 : f32
    %64 = vector.broadcast %cst_25 : f32 to vector<8x128xf32>
    %65 = arith.mulf %64, %63 : vector<8x128xf32>
    %66 = arith.maximumf %63, %65 : vector<8x128xf32>
    %67 = vector.extract_strided_slice %66 {offsets = [0, 0], sizes = [8, 48], strides = [1, 1]} : vector<8x128xf32> to vector<8x48xf32>
    %68 = arith.truncf %67 : vector<8x48xf32> to vector<8x48xbf16>
    %c96 = arith.constant 96 : index
    %c0_26 = arith.constant 0 : index
    %69 = vector.load %arg1[%c96, %c0_26] : memref<272x128xbf16, #tpu.memory_space<vmem>>, vector<48x128xbf16>
    %cst_27 = arith.constant dense<0.000000e+00> : vector<8x128xf32>
    %70 = tpu.matmul %68, %69, %cst_27 {dimension_numbers = #tpu.dot_dimension_numbers<[1], [0], [0], [1], [0, 0, 1, 1], [], []>} : vector<8x48xbf16>, vector<48x128xbf16>, vector<8x128xf32> -> vector<8x128xf32>
    %c5 = arith.constant 5 : index
    %c0_28 = arith.constant 0 : index
    %71 = vector.load %arg2[%c5, %c0_28] : memref<16x128xf32, #tpu.memory_space<vmem>>, vector<1x128xf32>
    %c6 = arith.constant 6 : index
    %c0_29 = arith.constant 0 : index
    %72 = vector.load %arg2[%c6, %c0_29] : memref<16x128xf32, #tpu.memory_space<vmem>>, vector<1x128xf32>
    %cst_30 = arith.constant dense<0.000000e+00> : vector<128xf32>
    %73 = vector.multi_reduction <add>, %70, %cst_30 [0] : vector<8x128xf32> to vector<128xf32>
    %74 = vector.shape_cast %73 : vector<128xf32> to vector<1x128xf32>
    %cst_31 = arith.constant 8.000000e+00 : f32
    %75 = vector.broadcast %cst_31 : f32 to vector<1x128xf32>
    %76 = arith.divf %74, %75 : vector<1x128xf32>
    %77 = vector.broadcast %76 : vector<1x128xf32> to vector<8x128xf32>
    %78 = arith.subf %70, %77 : vector<8x128xf32>
    %79 = arith.mulf %78, %78 : vector<8x128xf32>
    %cst_32 = arith.constant dense<0.000000e+00> : vector<128xf32>
    %80 = vector.multi_reduction <add>, %79, %cst_32 [0] : vector<8x128xf32> to vector<128xf32>
    %81 = vector.shape_cast %80 : vector<128xf32> to vector<1x128xf32>
    %cst_33 = arith.constant 8.000000e+00 : f32
    %82 = vector.broadcast %cst_33 : f32 to vector<1x128xf32>
    %83 = arith.divf %81, %82 : vector<1x128xf32>
    %cst_34 = arith.constant 8.000000e-01 : f32
    %84 = vector.broadcast %cst_34 : f32 to vector<1x128xf32>
    %85 = arith.addf %83, %84 : vector<1x128xf32>
    %86 = math.rsqrt %85 : vector<1x128xf32>
    %87 = arith.mulf %71, %86 : vector<1x128xf32>
    %88 = vector.broadcast %87 : vector<1x128xf32> to vector<8x128xf32>
    %89 = arith.mulf %78, %88 : vector<8x128xf32>
    %90 = vector.broadcast %72 : vector<1x128xf32> to vector<8x128xf32>
    %91 = arith.addf %89, %90 : vector<8x128xf32>
    %cst_35 = arith.constant 2.000000e-01 : f32
    %92 = vector.broadcast %cst_35 : f32 to vector<8x128xf32>
    %93 = arith.mulf %92, %91 : vector<8x128xf32>
    %94 = arith.maximumf %91, %93 : vector<8x128xf32>
    %95 = vector.extract_strided_slice %94 {offsets = [0, 0], sizes = [8, 64], strides = [1, 1]} : vector<8x128xf32> to vector<8x64xf32>
    %96 = arith.truncf %95 : vector<8x64xf32> to vector<8x64xbf16>
    %c144 = arith.constant 144 : index
    %c0_36 = arith.constant 0 : index
    %97 = vector.load %arg1[%c144, %c0_36] : memref<272x128xbf16, #tpu.memory_space<vmem>>, vector<64x128xbf16>
    %cst_37 = arith.constant dense<0.000000e+00> : vector<8x128xf32>
    %98 = tpu.matmul %96, %97, %cst_37 {dimension_numbers = #tpu.dot_dimension_numbers<[1], [0], [0], [1], [0, 0, 1, 1], [], []>} : vector<8x64xbf16>, vector<64x128xbf16>, vector<8x128xf32> -> vector<8x128xf32>
    %c7 = arith.constant 7 : index
    %c0_38 = arith.constant 0 : index
    %99 = vector.load %arg2[%c7, %c0_38] : memref<16x128xf32, #tpu.memory_space<vmem>>, vector<1x128xf32>
    %c8 = arith.constant 8 : index
    %c0_39 = arith.constant 0 : index
    %100 = vector.load %arg2[%c8, %c0_39] : memref<16x128xf32, #tpu.memory_space<vmem>>, vector<1x128xf32>
    %cst_40 = arith.constant dense<0.000000e+00> : vector<128xf32>
    %101 = vector.multi_reduction <add>, %98, %cst_40 [0] : vector<8x128xf32> to vector<128xf32>
    %102 = vector.shape_cast %101 : vector<128xf32> to vector<1x128xf32>
    %cst_41 = arith.constant 8.000000e+00 : f32
    %103 = vector.broadcast %cst_41 : f32 to vector<1x128xf32>
    %104 = arith.divf %102, %103 : vector<1x128xf32>
    %105 = vector.broadcast %104 : vector<1x128xf32> to vector<8x128xf32>
    %106 = arith.subf %98, %105 : vector<8x128xf32>
    %107 = arith.mulf %106, %106 : vector<8x128xf32>
    %cst_42 = arith.constant dense<0.000000e+00> : vector<128xf32>
    %108 = vector.multi_reduction <add>, %107, %cst_42 [0] : vector<8x128xf32> to vector<128xf32>
    %109 = vector.shape_cast %108 : vector<128xf32> to vector<1x128xf32>
    %cst_43 = arith.constant 8.000000e+00 : f32
    %110 = vector.broadcast %cst_43 : f32 to vector<1x128xf32>
    %111 = arith.divf %109, %110 : vector<1x128xf32>
    %cst_44 = arith.constant 8.000000e-01 : f32
    %112 = vector.broadcast %cst_44 : f32 to vector<1x128xf32>
    %113 = arith.addf %111, %112 : vector<1x128xf32>
    %114 = math.rsqrt %113 : vector<1x128xf32>
    %115 = arith.mulf %99, %114 : vector<1x128xf32>
    %116 = vector.broadcast %115 : vector<1x128xf32> to vector<8x128xf32>
    %117 = arith.mulf %106, %116 : vector<8x128xf32>
    %118 = vector.broadcast %100 : vector<1x128xf32> to vector<8x128xf32>
    %119 = arith.addf %117, %118 : vector<8x128xf32>
    %cst_45 = arith.constant 2.000000e-01 : f32
    %120 = vector.broadcast %cst_45 : f32 to vector<8x128xf32>
    %121 = arith.mulf %120, %119 : vector<8x128xf32>
    %122 = arith.maximumf %119, %121 : vector<8x128xf32>
    %c9 = arith.constant 9 : index
    %c0_46 = arith.constant 0 : index
    %123 = vector.load %arg2[%c9, %c0_46] : memref<16x128xf32, #tpu.memory_space<vmem>>, vector<1x128xf32>
    %124 = vector.extract_strided_slice %122 {offsets = [0, 0], sizes = [8, 64], strides = [1, 1]} : vector<8x128xf32> to vector<8x64xf32>
    %125 = arith.truncf %124 : vector<8x64xf32> to vector<8x64xbf16>
    %c208 = arith.constant 208 : index
    %c0_47 = arith.constant 0 : index
    %126 = vector.load %arg1[%c208, %c0_47] : memref<272x128xbf16, #tpu.memory_space<vmem>>, vector<64x128xbf16>
    %cst_48 = arith.constant dense<0.000000e+00> : vector<8x128xf32>
    %127 = tpu.matmul %125, %126, %cst_48 {dimension_numbers = #tpu.dot_dimension_numbers<[1], [0], [0], [1], [0, 0, 1, 1], [], []>} : vector<8x64xbf16>, vector<64x128xbf16>, vector<8x128xf32> -> vector<8x128xf32>
    %128 = vector.broadcast %123 : vector<1x128xf32> to vector<8x128xf32>
    %129 = arith.addf %127, %128 : vector<8x128xf32>
    %130 = math.tanh %129 : vector<8x128xf32>
    %c0_49 = arith.constant 0 : index
    %c0_50 = arith.constant 0 : index
    %131 = vector.load %arg3[%c0_49, %c0_50] : memref<8x128xf32, #tpu.memory_space<vmem>>, vector<8x128xf32>
    tpu.vector_store %arg3[%c0_49, %c0_50], %130 {strides = array<i32>} : memref<8x128xf32, #tpu.memory_space<vmem>>, vector<8x128xf32>,
    return
  }
}

</mosaic_0001>

<bundles_post_ra>
// kernel: tpu_custom_call.1
= control target key start
LH: loop header
LB: loop body
LE: loop exit
PB: predicated region body
PF: predicated region fallthrough
CT: control target
= control target key end

     0   :  { %8 = vsyncpa [#allocation3], 0  ;;  %s981_s0 = inlined_call_operand.hbm [shape: f32[8,128], index: 0, kind: input, shape index: {}]   ;;  %s982_s1 = inlined_call_operand.hbm [shape: bf16[272,128], index: 1, kind: input, shape index: {}]   ;;  %s983_s2 = inlined_call_operand.hbm [shape: f32[16,128], index: 2, kind: input, shape index: {}]   ;;  %s984_s3 = inlined_call_operand.hbm [shape: f32[8,128], index: 3, kind: output, shape index: {}]  }
   0x1   :  { %9 = vsyncpa [#allocation6], 0 }
   0x2   :  { %10 = vsyncpa [#allocation4], 0  ;;  %s864_s12 = smov [#allocation5]   ;;  %s770_s16 = scalar_lea.hbm %s982_s1, 2176 }
   0x3   :  { %s26_s13 = sshll.u32 %s864_s12, 4  ;;  %p771_p0 = scmp.ne.s32.totalorder %s982_s1, %s770_s16  ;;  %s27_s13 = int_to_ptr.vmem [resolvable:$true] %s26_s13 }
   0x4   :  { %p774_p1 = scmp.lt.u32.totalorder %s770_s16, %s982_s1 }
   0x6   :  { %p776_p2 = pnand %p774_p1, %p771_p0 }
   0x8   :  { %779 = shalt.err (!%p776_p2)
}
   0x9   :  { %s780_s21 = scalar_lea.vmem %s27_s13, 2176  ;;  %p785_p4 = scmp.lt.s32.totalorder %s27_s13, %s27_s13 }
   0xa   :  { %p781_p3 = scmp.ne.s32.totalorder %s27_s13, %s780_s21  ;;  %p786_p5 = scmp.lt.s32.totalorder %s780_s21, %s780_s21 }
   0xc   :  { %p787_p6 = por %p786_p5, %p785_p4 }
   0xe   :  { %p788_p7 = pnand %p787_p6, %p781_p3 }
  0x10   :  { %791 = shalt.err (!%p788_p7)
}
  0x11   :  { %s865_s22 = smov 64   ;;  %s866_s23 = smov 4  }
  0x12   :  { %32 = dma.hbm_to_vmem [thread:$0]  %s982_s1, 2176, %s27_s13, [#allocation6], %s865_s22, %s865_s22, %s866_s23  }
  0x13   :  { %s867_s26 = smov [#allocation2]   ;;  %s868_s28 = smov [#allocation7]  }
  0x14   :  { %s17_s27 = sshll.u32 %s867_s26, 4  ;;  %s38_s29 = sshll.u32 %s868_s28, 4  ;;  %s18_s27 = int_to_ptr.vmem [resolvable:$true] %s17_s27  ;;  %s39_s29 = int_to_ptr.vmem [resolvable:$true] %s38_s29 }
  0x15   :  { %s792_s5 = scalar_lea.hbm %s981_s0, 128 }
  0x16   :  { %p793_p8 = scmp.ne.s32.totalorder %s981_s0, %s792_s5  ;;  %p796_p9 = scmp.lt.u32.totalorder %s792_s5, %s981_s0 }
  0x18   :  { %p798_p10 = pnand %p796_p9, %p793_p8 }
  0x1a   :  { %801 = shalt.err (!%p798_p10)
}
  0x1b   :  { %s802_s1 = scalar_lea.vmem %s18_s27, 128  ;;  %p807_p12 = scmp.lt.s32.totalorder %s18_s27, %s18_s27 }
  0x1c   :  { %p803_p11 = scmp.ne.s32.totalorder %s18_s27, %s802_s1  ;;  %p808_p13 = scmp.lt.s32.totalorder %s802_s1, %s802_s1 }
  0x1e   :  { %p809_p0 = por %p808_p13, %p807_p12 }
  0x20   :  { %p810_p1 = pnand %p809_p0, %p803_p11 }
  0x22   :  { %813 = shalt.err (!%p810_p1)
}
  0x23   :  { %20 = dma.hbm_to_vmem [thread:$0]  %s981_s0, 128, %s18_s27, [#allocation3]  }
  0x24   :  { %s814_s14 = scalar_lea.hbm %s983_s2, 256 }
  0x25   :  { %p815_p2 = scmp.ne.s32.totalorder %s983_s2, %s814_s14  ;;  %p818_p3 = scmp.lt.u32.totalorder %s814_s14, %s983_s2 }
  0x27   :  { %p820_p4 = pnand %p818_p3, %p815_p2 }
  0x29   :  { %823 = shalt.err (!%p820_p4)
}
  0x2a   :  { %s824_s19 = scalar_lea.vmem %s39_s29, 256  ;;  %p829_p6 = scmp.lt.s32.totalorder %s39_s29, %s39_s29 }
  0x2b   :  { %p825_p5 = scmp.ne.s32.totalorder %s39_s29, %s824_s19  ;;  %p830_p7 = scmp.lt.s32.totalorder %s824_s19, %s824_s19 }
  0x2d   :  { %p831_p8 = por %p830_p7, %p829_p6 }
  0x2f   :  { %p832_p9 = pnand %p831_p8, %p825_p5 }
  0x31   :  { %835 = shalt.err (!%p832_p9)
}
  0x32   :  { %s869_s0 = smov 128   ;;  %s870_s20 = smov 8  }
  0x33   :  { %44 = dma.hbm_to_vmem [thread:$0]  %s983_s2, 256, %s39_s29, [#allocation6], %s869_s0, %s869_s0, %s870_s20  }
  0x34   :  { %858 = dma.done.wait [#allocation3], 128  }
  0x35   :  { %859 = vsyncadd [#allocation3], 4294967168 }
  0x36   :  { %860 = dma.done.wait [#allocation6], 2432  }
  0x37   :  { %861 = vsyncadd [#allocation6], 4294964864  ;;  %v871_v0 = vmov 0.0   ;;  %vm872_vm0 = vmmov 0   ;;  %v743_v1 = vld [vmem:[#allocation5] sm:$0xff]   ;;  %v55_v2 = vld [vmem:[#allocation2] sm:$0xff]  ;;  %v199_v39 = vlaneseq }
  0x38   :  { %675 = vmatprep.subr.bf16.mxu0 %v871_v0  ;;  %677 = vmatprep.mubr.msk.bf16.mxu0 %vm872_vm0, %v871_v0  ;;  %vm70_vm1 = vcmask 130048   ;;  %v56_v3 = vpack.c.bf16 %v55_v2, %v55_v2  ;;  %v744_v4 = vld [vmem:[#allocation5 + $0x8] sm:$0xff]   ;;  %v745_v5 = vld [vmem:[#allocation5 + $0x10] sm:$0xff]   ;;  %vm133_vm2 = vcmask 261120   ;;  %v746_v15 = vld [vmem:[#allocation5 + $0x18] sm:$0xff]   ;;  %vm236_vm3 = vcmask 392192  }
  0x39   :  { %681 = vmatprep.subr.bf16.mxu1 %v871_v0  ;;  %685 = vmatprep.mubr.msk.bf16.mxu1 %vm872_vm0, %v871_v0  ;;  %v623_v6 = vld [vmem:[#allocation7] ss:$0 sm:$0xff]  ;;  %v747_v16 = vld [vmem:[#allocation5 + $0x20] sm:$0xff]   ;;  %v200_v40 = vshrl.u32 %v199_v39, 7  ;;  %v177_v41 = vld [vmem:[#allocation7 + $0x1] sm:$0x1] }
  0x3a   :  { %676 = vmatpush3.bf16.msra.mxu0 %v743_v1  ;;  %682 = vmatpush3.bf16.msra.mxu1 %v744_v4  ;;  %v748_v17 = vld [vmem:[#allocation5 + $0x28] sm:$0xff]   ;;  %v749_v52 = vld [vmem:[#allocation5 + $0x30] sm:$0xff]   ;;  %v750_v53 = vld [vmem:[#allocation5 + $0x38] sm:$0xff]   ;;  %vm447_vm4 = vcmask 523264   ;;  %s873_s2 = smov [#allocation8]  }
  0x3b   :  { %689 = vmatprep.subr.bf16.mxu0 %v871_v0  ;;  %683 = vmatprep.subr.bf16.mxu1 %v871_v0  ;;  %v946_v42 = vsub.s32 0, %v200_v40  ;;  %v629_v46 = vld [vmem:[#allocation7 + $0x2] ss:$0 sm:$0xff]  ;;  %v751_v54 = vld [vmem:[#allocation5 + $0x40] sm:$0xff]   ;;  %s613_s23 = sshll.u32 %s873_s2, 4  ;;  %s614_s23 = int_to_ptr.vmem [resolvable:$true] %s613_s23 }
  0x3c   :  { %s836_s24 = scalar_lea.vmem %s614_s23, 128  ;;  %p841_p11 = scmp.lt.s32.totalorder %s614_s23, %s614_s23 }
  0x3d   :  { %678 = vmatmul.mubr.msk.bf16.vlgmr.msra.gmra.mrb[0].mxu0 %vm70_vm1, %v56_v3  ;;  %p837_p10 = scmp.ne.s32.totalorder %s614_s23, %s836_s24  ;;  %p842_p12 = scmp.lt.s32.totalorder %s836_s24, %s836_s24 }
  0x3e   :  { %695 = vmatprep.mubr.msk.bf16.mxu0 %vm872_vm0, %v871_v0  ;;  %684 = vmatpush3.bf16.msra.mxu1 %v745_v5 }
  0x3f   :  { %699 = vmatprep.subr.bf16.mxu1 %v871_v0  ;;  %690 = vmatpush3.bf16.msra.mxu0 %v746_v15  ;;  %p843_p13 = por %p842_p12, %p841_p11 }
  0x40   :  { %691 = vmatprep.subr.bf16.mxu0 %v871_v0 }
  0x41   :  { %p844_p0 = pnand %p843_p13, %p837_p10 }
  0x43   :  { %692 = vmatpush3.bf16.msra.mxu0 %v747_v16 }
  0x44   :  { %693 = vmatprep.subr.bf16.mxu0 %v871_v0 }
  0x47   :  { %694 = vmatpush3.bf16.msra.mxu0 %v748_v17  ;;  %v634_v17 = vld [vmem:[#allocation7 + $0x4] ss:$0 sm:$0xff] }
  0x48   :  { %709 = vmatprep.subr.bf16.mxu0 %v871_v0 }
 0x110   :  { %v108_v7 = vpop.f32.mrb[0].mxu0 }
 0x111   :  { %v109_v8 = vadd.f32 %v623_v6, %v108_v7  ;;  %v679_v9 = vpop.f32.mrb[1].mxu0 }
 0x112   :  { %v111_v10 = vpop.f32.mrb[2].mxu0 }
 0x113   :  { %v114_v11 = vmul.f32 0.2, %v109_v8  ;;  %v680_v12 = vpop.f32.mrb[3].mxu0 }
 0x115   :  { %v115_v13 = vmax.f32 %v109_v8, %v114_v11 }
 0x117   :  { %v116_v14 = vpack.c.bf16 %v115_v13, %v115_v13  ;;  %v280_v13 = vld [vmem:[#allocation7 + $0x3] sm:$0x1] }
 0x119   :  { %686 = vmatmul.mubr.msk.bf16.vlgmr.msra.gmra.mrb[0].mxu1 %vm133_vm2, %v116_v14 }
 0x11a   :  { %705 = vmatprep.mubr.msk.bf16.mxu1 %vm872_vm0, %v871_v0  ;;  %700 = vmatpush3.bf16.msra.mxu1 %v749_v52 }
 0x11b   :  { %701 = vmatprep.subr.bf16.mxu1 %v871_v0 }
 0x11e   :  { %702 = vmatpush3.bf16.msra.mxu1 %v750_v53  ;;  %v639_v53 = vld [vmem:[#allocation7 + $0x6] ss:$0 sm:$0xff] }
 0x11f   :  { %703 = vmatprep.subr.bf16.mxu1 %v871_v0 }
 0x122   :  { %704 = vmatpush3.bf16.msra.mxu1 %v751_v54 }
 0x123   :  { %721 = vmatprep.subr.bf16.mxu1 %v871_v0 }
 0x1ec   :  { %v171_v18 = vpop.f32.mrb[0].mxu1 }
 0x1ed   :  { %v179_v19 = vrot.slane %v171_v18, 4  ;;  %v687_v20 = vpop.f32.mrb[1].mxu1 }
 0x1ee   :  { %v174_v21 = vpop.f32.mrb[2].mxu1 }
 0x1ef   :  { %v180_v22 = vadd.f32 %v179_v19, %v171_v18  ;;  %v688_v23 = vpop.f32.mrb[3].mxu1 }
 0x1f0   :  { %v752_v23 = vld [vmem:[#allocation5 + $0x48] sm:$0xff]  }
 0x1f1   :  { %v181_v24 = vrot.slane %v180_v22, 2 }
 0x1f3   :  { %v182_v25 = vadd.f32 %v181_v24, %v180_v22  ;;  %v753_v24 = vld [vmem:[#allocation5 + $0x50] sm:$0xff]  }
 0x1f5   :  { %v183_v26 = vrot.slane %v182_v25, 1 }
 0x1f7   :  { %v184_v27 = vadd.f32 %v183_v26, %v182_v25  ;;  %v754_v25 = vld [vmem:[#allocation5 + $0x58] sm:$0xff]   ;;  %v755_v26 = vld [vmem:[#allocation5 + $0x60] sm:$0xff]  }
 0x1f9   :  { %v186_v28 = vmul.f32 0.125, %v184_v27 }
 0x1fb   :  { %v187_v29 = vsub.f32 %v171_v18, %v186_v28 }
 0x1fd   :  { %v188_v30 = vmul.f32 %v187_v29, %v187_v29 }
 0x1ff   :  { %v189_v31 = vrot.slane %v188_v30, 4 }
 0x201   :  { %v190_v32 = vadd.f32 %v189_v31, %v188_v30 }
 0x203   :  { %v191_v33 = vrot.slane %v190_v32, 2 }
 0x205   :  { %v192_v34 = vadd.f32 %v191_v33, %v190_v32 }
 0x207   :  { %v193_v35 = vrot.slane %v192_v34, 1 }
 0x209   :  { %v194_v36 = vadd.f32 %v193_v35, %v192_v34 }
 0x20b   :  { %v195_v37 = vmul.f32 0.125, %v194_v36 }
 0x20d   :  { %v196_v38 = vadd.f32 0.8, %v195_v37 }
 0x20f   :  { %760 = vrsqrt.f32 %v196_v38 }
 0x219   :  { %v761_v43 = vpop.eup %760 }
 0x21a   :  { %v198_v44 = vmul.f32 %v761_v43, %v177_v41 }
 0x21c   :  { %v202_v45 = vrot.slane %v198_v44, %v946_v42 }
 0x21e   :  { %v203_v47 = vmul.f32 %v202_v45, %v187_v29 }
 0x220   :  { %v208_v48 = vadd.f32 %v629_v46, %v203_v47 }
 0x222   :  { %v209_v49 = vmul.f32 0.2, %v208_v48 }
 0x224   :  { %v210_v50 = vmax.f32 %v208_v48, %v209_v49  ;;  %v381_v49 = vld [vmem:[#allocation7 + $0x5] sm:$0x1] }
 0x226   :  { %v211_v51 = vpack.c.bf16 %v210_v50, %v210_v50 }
 0x228   :  { %696 = vmatmul.mubr.msk.bf16.vlgmr.msra.gmra.mrb[4].mxu0 %vm236_vm3, %v211_v51 }
 0x229   :  { %717 = vmatprep.mubr.msk.bf16.mxu0 %vm872_vm0, %v871_v0  ;;  %710 = vmatpush3.bf16.msra.mxu0 %v752_v23 }
 0x22a   :  { %711 = vmatprep.subr.bf16.mxu0 %v871_v0 }
 0x22d   :  { %712 = vmatpush3.bf16.msra.mxu0 %v753_v24  ;;  %v645_v24 = vld [vmem:[#allocation7 + $0x8] ss:$0 sm:$0xff] }
 0x22e   :  { %713 = vmatprep.subr.bf16.mxu0 %v871_v0 }
 0x231   :  { %714 = vmatpush3.bf16.msra.mxu0 %v754_v25 }
 0x232   :  { %715 = vmatprep.subr.bf16.mxu0 %v871_v0 }
 0x235   :  { %716 = vmatpush3.bf16.msra.mxu0 %v755_v26 }
 0x2fb   :  { %v274_v55 = vpop.f32.mrb[4].mxu0 }
 0x2fc   :  { %v282_v56 = vrot.slane %v274_v55, 4  ;;  %v697_v57 = vpop.f32.mrb[5].mxu0 }
 0x2fd   :  { %v277_v58 = vpop.f32.mrb[6].mxu0 }
 0x2fe   :  { %v283_v59 = vadd.f32 %v282_v56, %v274_v55  ;;  %v698_v60 = vpop.f32.mrb[7].mxu0 }
 0x2ff   :  { %v757_v60 = vld [vmem:[#allocation5 + $0x70] sm:$0xff]  }
 0x300   :  { %v284_v61 = vrot.slane %v283_v59, 2 }
 0x302   :  { %v285_v62 = vadd.f32 %v284_v61, %v283_v59  ;;  %v756_v59 = vld [vmem:[#allocation5 + $0x68] sm:$0xff]   ;;  %v758_v61 = vld [vmem:[#allocation5 + $0x78] sm:$0xff]  }
 0x304   :  { %v286_v63 = vrot.slane %v285_v62, 1 }
 0x306   :  { %v287_v1 = vadd.f32 %v286_v63, %v285_v62  ;;  %v759_v62 = vld [vmem:[#allocation5 + $0x80] sm:$0xff]  }
 0x308   :  { %v288_v2 = vmul.f32 0.125, %v287_v1 }
 0x30a   :  { %v289_v3 = vsub.f32 %v274_v55, %v288_v2 }
 0x30c   :  { %v290_v4 = vmul.f32 %v289_v3, %v289_v3 }
 0x30e   :  { %v291_v5 = vrot.slane %v290_v4, 4 }
 0x310   :  { %v292_v6 = vadd.f32 %v291_v5, %v290_v4 }
 0x312   :  { %v293_v7 = vrot.slane %v292_v6, 2 }
 0x314   :  { %v294_v8 = vadd.f32 %v293_v7, %v292_v6 }
 0x316   :  { %v295_v9 = vrot.slane %v294_v8, 1 }
 0x318   :  { %v296_v10 = vadd.f32 %v295_v9, %v294_v8 }
 0x31a   :  { %v297_v11 = vmul.f32 0.125, %v296_v10 }
 0x31c   :  { %v298_v12 = vadd.f32 0.8, %v297_v11 }
 0x31e   :  { %762 = vrsqrt.f32 %v298_v12 }
 0x328   :  { %v763_v14 = vpop.eup %762 }
 0x329   :  { %v300_v15 = vmul.f32 %v763_v14, %v280_v13 }
 0x32b   :  { %v304_v16 = vrot.slane %v300_v15, %v946_v42 }
 0x32d   :  { %v305_v18 = vmul.f32 %v304_v16, %v289_v3 }
 0x32f   :  { %v310_v19 = vadd.f32 %v634_v17, %v305_v18 }
 0x331   :  { %v311_v20 = vmul.f32 0.2, %v310_v19 }
 0x333   :  { %v312_v21 = vmax.f32 %v310_v19, %v311_v20  ;;  %v491_v20 = vld [vmem:[#allocation7 + $0x7] sm:$0x1] }
 0x335   :  { %v313_v22 = vpack.c.bf16 %v312_v21, %v312_v21 }
 0x337   :  { %706 = vmatmul.mubr.msk.bf16.vlgmr.msra.gmra.mrb[4].mxu1 %vm236_vm3, %v313_v22 }
 0x338   :  { %729 = vmatprep.mubr.msk.bf16.mxu1 %vm872_vm0, %v871_v0  ;;  %722 = vmatpush3.bf16.msra.mxu1 %v756_v59 }
 0x339   :  { %723 = vmatprep.subr.bf16.mxu1 %v871_v0 }
 0x33c   :  { %724 = vmatpush3.bf16.msra.mxu1 %v757_v60 }
 0x33d   :  { %725 = vmatprep.subr.bf16.mxu1 %v871_v0 }
 0x340   :  { %726 = vmatpush3.bf16.msra.mxu1 %v758_v61 }
 0x341   :  { %727 = vmatprep.subr.bf16.mxu1 %v871_v0 }
 0x344   :  { %728 = vmatpush3.bf16.msra.mxu1 %v759_v62 }
 0x40a   :  { %v375_v27 = vpop.f32.mrb[4].mxu1 }
 0x40b   :  { %v383_v28 = vrot.slane %v375_v27, 4  ;;  %v707_v29 = vpop.f32.mrb[5].mxu1 }
 0x40c   :  { %v378_v30 = vpop.f32.mrb[6].mxu1 }
 0x40d   :  { %v384_v31 = vadd.f32 %v383_v28, %v375_v27  ;;  %v708_v32 = vpop.f32.mrb[7].mxu1  ;;  %v646_v30 = vld [vmem:[#allocation7 + $0x9] ss:$0 sm:$0xff] }
 0x40f   :  { %v385_v33 = vrot.slane %v384_v31, 2 }
 0x411   :  { %v386_v34 = vadd.f32 %v385_v33, %v384_v31 }
 0x413   :  { %v387_v35 = vrot.slane %v386_v34, 1 }
 0x415   :  { %v388_v36 = vadd.f32 %v387_v35, %v386_v34 }
 0x417   :  { %v389_v37 = vmul.f32 0.125, %v388_v36 }
 0x419   :  { %v390_v38 = vsub.f32 %v375_v27, %v389_v37 }
 0x41b   :  { %v391_v39 = vmul.f32 %v390_v38, %v390_v38 }
 0x41d   :  { %v392_v40 = vrot.slane %v391_v39, 4 }
 0x41f   :  { %v393_v41 = vadd.f32 %v392_v40, %v391_v39 }
 0x421   :  { %v394_v43 = vrot.slane %v393_v41, 2 }
 0x423   :  { %v395_v44 = vadd.f32 %v394_v43, %v393_v41 }
 0x425   :  { %v396_v45 = vrot.slane %v395_v44, 1 }
 0x427   :  { %v397_v46 = vadd.f32 %v396_v45, %v395_v44 }
 0x429   :  { %v398_v47 = vmul.f32 0.125, %v397_v46 }
 0x42b   :  { %v399_v48 = vadd.f32 0.8, %v398_v47 }
 0x42d   :  { %764 = vrsqrt.f32 %v399_v48 }
 0x437   :  { %v765_v50 = vpop.eup %764 }
 0x438   :  { %v401_v51 = vmul.f32 %v765_v50, %v381_v49 }
 0x43a   :  { %v405_v52 = vrot.slane %v401_v51, %v946_v42 }
 0x43c   :  { %v406_v54 = vmul.f32 %v405_v52, %v390_v38 }
 0x43e   :  { %v411_v55 = vadd.f32 %v639_v53, %v406_v54 }
 0x440   :  { %v412_v56 = vmul.f32 0.2, %v411_v55 }
 0x442   :  { %v413_v57 = vmax.f32 %v411_v55, %v412_v56 }
 0x444   :  { %v414_v58 = vpack.c.bf16 %v413_v57, %v413_v57 }
 0x446   :  { %718 = vmatmul.mubr.msk.bf16.vlgmr.msra.gmra.mrb[8].mxu0 %vm447_vm4, %v414_v58 }
 0x519   :  { %v485_v63 = vpop.f32.mrb[8].mxu0 }
 0x51a   :  { %v493_v1 = vrot.slane %v485_v63, 4  ;;  %v719_v2 = vpop.f32.mrb[9].mxu0 }
 0x51b   :  { %v488_v3 = vpop.f32.mrb[10].mxu0 }
 0x51c   :  { %v494_v4 = vadd.f32 %v493_v1, %v485_v63  ;;  %v720_v5 = vpop.f32.mrb[11].mxu0 }
 0x51e   :  { %v495_v6 = vrot.slane %v494_v4, 2 }
 0x520   :  { %v496_v7 = vadd.f32 %v495_v6, %v494_v4 }
 0x522   :  { %v497_v8 = vrot.slane %v496_v7, 1 }
 0x524   :  { %v498_v9 = vadd.f32 %v497_v8, %v496_v7 }
 0x526   :  { %v499_v10 = vmul.f32 0.125, %v498_v9 }
 0x528   :  { %v500_v11 = vsub.f32 %v485_v63, %v499_v10 }
 0x52a   :  { %v501_v12 = vmul.f32 %v500_v11, %v500_v11 }
 0x52c   :  { %v502_v13 = vrot.slane %v501_v12, 4 }
 0x52e   :  { %v503_v14 = vadd.f32 %v502_v13, %v501_v12 }
 0x530   :  { %v504_v15 = vrot.slane %v503_v14, 2 }
 0x532   :  { %v505_v16 = vadd.f32 %v504_v15, %v503_v14 }
 0x534   :  { %v506_v0 = vrot.slane %v505_v16, 1 }
 0x536   :  { %v507_v17 = vadd.f32 %v506_v0, %v505_v16 }
 0x538   :  { %v508_v18 = vmul.f32 0.125, %v507_v17 }
 0x53a   :  { %v509_v19 = vadd.f32 0.8, %v508_v18 }
 0x53c   :  { %766 = vrsqrt.f32 %v509_v19 }
 0x546   :  { %v767_v21 = vpop.eup %766 }
 0x547   :  { %v511_v22 = vmul.f32 %v767_v21, %v491_v20 }
 0x549   :  { %v515_v23 = vrot.slane %v511_v22, %v946_v42 }
 0x54b   :  { %v516_v25 = vmul.f32 %v515_v23, %v500_v11 }
 0x54d   :  { %v521_v26 = vadd.f32 %v645_v24, %v516_v25 }
 0x54f   :  { %v522_v27 = vmul.f32 0.2, %v521_v26 }
 0x551   :  { %v523_v28 = vmax.f32 %v521_v26, %v522_v27 }
 0x553   :  { %v525_v29 = vpack.c.bf16 %v523_v28, %v523_v28 }
 0x555   :  { %730 = vmatmul.mubr.msk.bf16.vlgmr.msra.gmra.mrb[8].mxu1 %vm447_vm4, %v525_v29 }
 0x628   :  { %v599_v31 = vpop.f32.mrb[8].mxu1 }
 0x629   :  { %v600_v32 = vadd.f32 %v646_v30, %v599_v31  ;;  %v731_v33 = vpop.f32.mrb[9].mxu1 }
 0x62a   :  { %v602_v34 = vpop.f32.mrb[10].mxu1 }
 0x62b   :  { %768 = vtanh.f32 %v600_v32  ;;  %v732_v35 = vpop.f32.mrb[11].mxu1 }
 0x635   :  { %v769_v36 = vpop.eup %768 }
 0x636   :  { %606 = vst [vmem:[#allocation8] sm:$0xff] %v769_v36 }
 0x637   :  { %847 = shalt.err (!%p844_p0)
}
 0x638   :  { %s848_s27 = scalar_lea.hbm %s984_s3, 128 }
 0x639   :  { %p849_p1 = scmp.ne.s32.totalorder %s984_s3, %s848_s27  ;;  %p852_p2 = scmp.lt.u32.totalorder %s848_s27, %s984_s3 }
 0x63b   :  { %p854_p3 = pnand %p852_p2, %p849_p1 }
 0x63d   :  { %857 = shalt.err (!%p854_p3)
}
 0x63e   :  { %616 = dma.vmem_to_hbm [thread:$0]  %s614_s23, 128, %s984_s3, [#allocation4]  }
 0x63f   :  { %862 = dma.done.wait [#allocation4], 128  }
 0x640   :  { %863 = vsyncadd [#allocation4], 4294967168 }
 0x641   :  { %620 = vsyncpa [#allocation3], 1 }
 0x642   :  { %621 = vsyncpa [#allocation6], 1 }
 0x643   :  { %622 = vsyncpa [#allocation4], 1 }

</bundles_post_ra>
